<compile_context>
chip_gen: v5e
topology: v5e:2x2
jax: 0.10.0
libtpu: 0.0.40
codegen_flags: <defaults>
</compile_context>

<pallas_src>
import jax
import jax.numpy as jnp
from jax.experimental import pallas as pl
from jax.experimental.pallas import tpu as pltpu

INPUT_DIM = 256   # input_dim of the module (multiple of 128)
HIDDEN = 512      # fixed by the module
OUTPUT_DIM = 128  # output_dim of the module (multiple of 128)


def _round_up(n, m):
    return ((n + m - 1) // m) * m


def mlp_kernel(x_ref, w1_ref, b1_ref, w2_ref, b2_ref, o_ref):
    # Cast the activation tile to bf16 in-kernel (VPU work hidden under DMA),
    # so the wrapper never runs a separate HBM cast pass over x.
    x = x_ref[...].astype(jnp.bfloat16)
    # fc1: bf16 MXU matmul, f32 accumulation.
    h = jnp.dot(x, w1_ref[...], preferred_element_type=jnp.float32)
    # bias + ReLU in f32.
    h = jnp.maximum(h + b1_ref[...], 0.0)
    # fc2: cast activation back to bf16 for MXU throughput, accumulate f32.
    # NOTE: D_out=128 fills only half the 256-wide MXU on v6e/v7x; expected.
    o = jnp.dot(h.astype(jnp.bfloat16), w2_ref[...],
                preferred_element_type=jnp.float32)
    o_ref[...] = (o + b2_ref[...]).astype(o_ref.dtype)


def prepare_params(w1, b1, w2, b2):
    """One-time param prep — keep OUT of the per-call/inference loop.

    Weights -> bf16 [in, out] for the MXU; biases -> f32 [1, out] rows.
    """
    return (w1.astype(jnp.bfloat16),
            jnp.asarray(b1, jnp.float32).reshape(1, -1),
            w2.astype(jnp.bfloat16),
            jnp.asarray(b2, jnp.float32).reshape(1, -1))


def _pick_tile(batch, tile_m, min_tm):
    """Pick a min_tm-aligned row tile that (a) stays <= ~tile_m, (b) minimizes
    padded rows in the last (masked) grid step — important on MXU-bound v5e —
    and (c) yields >= 2 grid steps when the batch is big enough so both v7x
    TensorCores get work."""
    max_steps = max(1, batch // min_tm)
    steps = min(max(pl.cdiv(batch, tile_m), 2), max_steps)
    return _round_up(pl.cdiv(batch, steps), min_tm)


def feedforward(x, w1_bf, b1, w2_bf, b2, *, tile_m=512, out_dtype=jnp.float32):
    """Fused fc1 -> relu -> fc2 forward pass.

    x:     [B, input_dim]    float32 (cast to bf16 inside the kernel)
    w1_bf: [input_dim, 512]  bfloat16 (transposed nn.Linear weight)
    b1:    [1, 512]          float32
    w2_bf: [512, output_dim] bfloat16 (transposed nn.Linear weight)
    b2:    [1, output_dim]   float32
    returns [B, output_dim] out_dtype (default float32)
    """
    B, D_in = x.shape
    D_hid = w1_bf.shape[1]
    D_out = w2_bf.shape[1]

    # Sublane alignment: 8 rows for f32 blocks, 16 if the output is bf16.
    min_tm = 16 if jnp.dtype(out_dtype).itemsize < 4 else 8
    tm = _pick_tile(B, tile_m, min_tm)
    grid = (pl.cdiv(B, tm),)  # ragged last tile is masked by Pallas

    return pl.pallas_call(
        mlp_kernel,
        out_shape=jax.ShapeDtypeStruct((B, D_out), out_dtype),
        grid_spec=pltpu.PrefetchScalarGridSpec(
            num_scalar_prefetch=0,
            grid=grid,
            in_specs=[
                # x tile: double-buffered / pipelined across the batch axis.
                pl.BlockSpec((tm, D_in), lambda i: (i, 0)),
                # Grid-invariant weights / biases: single-buffered (fetched
                # once; constant index_map elides per-step re-DMA).
                pl.BlockSpec((D_in, D_hid), lambda i: (0, 0),
                             pipeline_mode=pl.Buffered(1)),
                pl.BlockSpec((1, D_hid), lambda i: (0, 0),
                             pipeline_mode=pl.Buffered(1)),
                pl.BlockSpec((D_hid, D_out), lambda i: (0, 0),
                             pipeline_mode=pl.Buffered(1)),
                pl.BlockSpec((1, D_out), lambda i: (0, 0),
                             pipeline_mode=pl.Buffered(1)),
            ],
            out_specs=pl.BlockSpec((tm, D_out), lambda i: (i, 0)),
        ),
        compiler_params=pltpu.CompilerParams(
            dimension_semantics=("parallel",),
        ),
    )(x, w1_bf, b1, w2_bf, b2)


def init_params(key, input_dim, output_dim):
    """Deterministic init mimicking nn.Linear's U(-1/sqrt(fan_in), 1/sqrt(fan_in))."""
    k1, k2, k3, k4 = jax.random.split(key, 4)
    bound1 = 1.0 / (input_dim ** 0.5)
    bound2 = 1.0 / (HIDDEN ** 0.5)
    # stored transposed: [in, out]
    w1 = jax.random.uniform(k1, (input_dim, HIDDEN), jnp.float32, -bound1, bound1)
    b1 = jax.random.uniform(k2, (1, HIDDEN), jnp.float32, -bound1, bound1)
    w2 = jax.random.uniform(k3, (HIDDEN, output_dim), jnp.float32, -bound2, bound2)
    b2 = jax.random.uniform(k4, (1, output_dim), jnp.float32, -bound2, bound2)
    return w1, b1, w2, b2


def _reference(x, w1, b1, w2, b2):
    # Mirrors the kernel's bf16-input / f32-accumulate math.
    xb = x.astype(jnp.bfloat16).astype(jnp.float32)
    w1b = w1.astype(jnp.bfloat16).astype(jnp.float32)
    w2b = w2.astype(jnp.bfloat16).astype(jnp.float32)
    h = jnp.maximum(xb @ w1b + b1.reshape(1, -1), 0.0)
    hb = h.astype(jnp.bfloat16).astype(jnp.float32)
    return hb @ w2b + b2.reshape(1, -1)


if __name__ == "__main__":
    key = jax.random.PRNGKey(0)
    kx, kx2, kp = jax.random.split(key, 3)

    w1, b1, w2, b2 = init_params(kp, INPUT_DIM, OUTPUT_DIM)
    # One-time prep of MXU-ready params (outside the per-call path).
    w1_bf, b1r, w2_bf, b2r = prepare_params(w1, b1, w2, b2)

    # Tiny batch: single grid step, block exactly covers the batch.
    batch = 8
    x = jax.random.normal(kx, (batch, INPUT_DIM), jnp.float32)
    out = jax.block_until_ready(feedforward(x, w1_bf, b1r, w2_bf, b2r))
    assert out.shape == (batch, OUTPUT_DIM)
    assert jnp.allclose(out, _reference(x, w1, b1, w2, b2), atol=1e-2, rtol=1e-2)

    # Non-multiple batch: 2 grid steps with a ragged (masked) last tile,
    # no jnp.pad / output-slice copies.
    batch2 = 200
    x2 = jax.random.normal(kx2, (batch2, INPUT_DIM), jnp.float32)
    out2 = jax.block_until_ready(feedforward(x2, w1_bf, b1r, w2_bf, b2r))
    assert out2.shape == (batch2, OUTPUT_DIM)
    assert jnp.allclose(out2, _reference(x2, w1, b1, w2, b2), atol=1e-2, rtol=1e-2)

    print("KERNEL_OK")
</pallas_src>

<mosaic_0001>
module attributes {stable_mosaic.version = 11 : i64} {
  func.func @mlp_kernel(%arg0: i32, %arg1: memref<8x256xf32, #tpu.memory_space<vmem>>, %arg2: memref<256x512xbf16, #tpu.memory_space<vmem>>, %arg3: memref<1x512xf32, #tpu.memory_space<vmem>>, %arg4: memref<512x128xbf16, #tpu.memory_space<vmem>>, %arg5: memref<1x128xf32, #tpu.memory_space<vmem>>, %arg6: memref<8x128xf32, #tpu.memory_space<vmem>>) attributes {dimension_semantics = [#tpu.dimension_semantics<parallel>], iteration_bounds = array<i64: 1>, scalar_prefetch = 0 : i64, scratch_operands = 0 : i64, tpu.core_type = #tpu.core_type<tc>, window_params = [{transform_indices = @transform_0, window_bounds = array<i64: 8, 256>}, {pipeline_mode = #tpu.pipeline_mode<synchronous>, transform_indices = @transform_1, window_bounds = array<i64: 256, 512>}, {pipeline_mode = #tpu.pipeline_mode<synchronous>, transform_indices = @transform_2, window_bounds = array<i64: 1, 512>}, {pipeline_mode = #tpu.pipeline_mode<synchronous>, transform_indices = @transform_3, window_bounds = array<i64: 512, 128>}, {pipeline_mode = #tpu.pipeline_mode<synchronous>, transform_indices = @transform_4, window_bounds = array<i64: 1, 128>}, {transform_indices = @transform_5, window_bounds = array<i64: 8, 128>}]} {
    %c0 = arith.constant 0 : index
    %c0_0 = arith.constant 0 : index
    %0 = vector.load %arg1[%c0, %c0_0] : memref<8x256xf32, #tpu.memory_space<vmem>>, vector<8x256xf32>
    %1 = arith.truncf %0 : vector<8x256xf32> to vector<8x256xbf16>
    %c0_1 = arith.constant 0 : index
    %c0_2 = arith.constant 0 : index
    %2 = vector.load %arg2[%c0_1, %c0_2] : memref<256x512xbf16, #tpu.memory_space<vmem>>, vector<256x512xbf16>
    %cst = arith.constant dense<0.000000e+00> : vector<8x512xf32>
    %3 = tpu.matmul %1, %2, %cst {dimension_numbers = #tpu.dot_dimension_numbers<[1], [0], [0], [1], [0, 0, 1, 1], [], []>} : vector<8x256xbf16>, vector<256x512xbf16>, vector<8x512xf32> -> vector<8x512xf32>
    %c0_3 = arith.constant 0 : index
    %c0_4 = arith.constant 0 : index
    %4 = vector.load %arg3[%c0_3, %c0_4] : memref<1x512xf32, #tpu.memory_space<vmem>>, vector<1x512xf32>
    %5 = vector.broadcast %4 : vector<1x512xf32> to vector<8x512xf32>
    %6 = arith.addf %3, %5 : vector<8x512xf32>
    %cst_5 = arith.constant 0.000000e+00 : f32
    %7 = vector.broadcast %cst_5 : f32 to vector<8x512xf32>
    %8 = arith.maximumf %6, %7 : vector<8x512xf32>
    %9 = arith.truncf %8 : vector<8x512xf32> to vector<8x512xbf16>
    %c0_6 = arith.constant 0 : index
    %c0_7 = arith.constant 0 : index
    %10 = vector.load %arg4[%c0_6, %c0_7] : memref<512x128xbf16, #tpu.memory_space<vmem>>, vector<512x128xbf16>
    %cst_8 = arith.constant dense<0.000000e+00> : vector<8x128xf32>
    %11 = tpu.matmul %9, %10, %cst_8 {dimension_numbers = #tpu.dot_dimension_numbers<[1], [0], [0], [1], [0, 0, 1, 1], [], []>} : vector<8x512xbf16>, vector<512x128xbf16>, vector<8x128xf32> -> vector<8x128xf32>
    %c0_9 = arith.constant 0 : index
    %c0_10 = arith.constant 0 : index
    %12 = vector.load %arg5[%c0_9, %c0_10] : memref<1x128xf32, #tpu.memory_space<vmem>>, vector<1x128xf32>
    %13 = vector.broadcast %12 : vector<1x128xf32> to vector<8x128xf32>
    %14 = arith.addf %11, %13 : vector<8x128xf32>
    %c0_11 = arith.constant 0 : index
    %c0_12 = arith.constant 0 : index
    %15 = vector.load %arg6[%c0_11, %c0_12] : memref<8x128xf32, #tpu.memory_space<vmem>>, vector<8x128xf32>
    tpu.vector_store %arg6[%c0_11, %c0_12], %14 {strides = array<i32>} : memref<8x128xf32, #tpu.memory_space<vmem>>, vector<8x128xf32>,
    return
  }
  func.func @transform_0(%arg0: i32) -> (i32, i32) {
    %c0_i32 = arith.constant 0 : i32
    %c0_i32_0 = arith.constant 0 : i32
    return %arg0, %c0_i32 : i32, i32
  }
  func.func @transform_1(%arg0: i32) -> (i32, i32) {
    %c0_i32 = arith.constant 0 : i32
    %c0_i32_0 = arith.constant 0 : i32
    %c0_i32_1 = arith.constant 0 : i32
    return %c0_i32, %c0_i32_0 : i32, i32
  }
  func.func @transform_2(%arg0: i32) -> (i32, i32) {
    %c0_i32 = arith.constant 0 : i32
    %c0_i32_0 = arith.constant 0 : i32
    %c0_i32_1 = arith.constant 0 : i32
    return %c0_i32, %c0_i32_0 : i32, i32
  }
  func.func @transform_3(%arg0: i32) -> (i32, i32) {
    %c0_i32 = arith.constant 0 : i32
    %c0_i32_0 = arith.constant 0 : i32
    %c0_i32_1 = arith.constant 0 : i32
    return %c0_i32, %c0_i32_0 : i32, i32
  }
  func.func @transform_4(%arg0: i32) -> (i32, i32) {
    %c0_i32 = arith.constant 0 : i32
    %c0_i32_0 = arith.constant 0 : i32
    %c0_i32_1 = arith.constant 0 : i32
    return %c0_i32, %c0_i32_0 : i32, i32
  }
  func.func @transform_5(%arg0: i32) -> (i32, i32) {
    %c0_i32 = arith.constant 0 : i32
    %c0_i32_0 = arith.constant 0 : i32
    return %arg0, %c0_i32 : i32, i32
  }
}

</mosaic_0001>

<bundles_post_ra>
// kernel: tpu_custom_call.1
= control target key start
LH: loop header
LB: loop body
LE: loop exit
PB: predicated region body
PF: predicated region fallthrough
CT: control target
= control target key end

     0   :  { %10 = vsyncpa [#allocation3], 0  ;;  %s1609_s0 = inlined_call_operand.hbm [shape: f32[8,256], index: 0, kind: input, shape index: {}]   ;;  %s1610_s1 = inlined_call_operand.hbm [shape: bf16[256,512], index: 1, kind: input, shape index: {}]   ;;  %s1611_s2 = inlined_call_operand.hbm [shape: f32[1,512], index: 2, kind: input, shape index: {}]   ;;  %s1612_s3 = inlined_call_operand.hbm [shape: bf16[512,128], index: 3, kind: input, shape index: {}]   ;;  %s1613_s4 = inlined_call_operand.vmem [shape: f32[1,128], index: 4, kind: input, shape index: {}]   ;;  %s1614_s5 = inlined_call_operand.hbm [shape: f32[8,128], index: 5, kind: output, shape index: {}]  }
   0x1   :  { %11 = vsyncpa [#allocation6], 0 }
   0x2   :  { %12 = vsyncpa [#allocation9], 0  ;;  %s29_s20 = sshll.u32 %s1610_s1, 4  ;;  %s30_s20 = int_to_ptr.hbm [resolvable:$true] %s29_s20 }
   0x3   :  { %13 = vsyncpa [#allocation4], 0  ;;  %s1540_s21 = smov [#allocation5]   ;;  %s19_s25 = sshll.u32 %s1609_s0, 4  ;;  %s20_s25 = int_to_ptr.hbm [resolvable:$true] %s19_s25 }
   0x4   :  { %s31_s22 = sshll.u32 %s1540_s21, 4  ;;  %s1541_s26 = smov 256   ;;  %s32_s22 = int_to_ptr.vmem [resolvable:$true] %s31_s22 }
   0x5   :  { %s1542_s27 = smov 16   ;;  %s1543_s28 = smov [#allocation2]  }
   0x6   :  { %37 = dma.hbm_to_vmem [thread:$0]  %s30_s20, 8192, %s32_s22, [#allocation6], %s1541_s26, %s1541_s26, %s1542_s27  }
   0x7   :  { %s21_s29 = sshll.u32 %s1543_s28, 4  ;;  %s43_s7 = sshll.u32 %s1611_s2, 4  ;;  %s22_s29 = int_to_ptr.vmem [resolvable:$true] %s21_s29  ;;  %s44_s7 = int_to_ptr.hbm [resolvable:$true] %s43_s7 }
   0x8   :  { %24 = dma.hbm_to_vmem [thread:$0]  %s20_s25, 256, %s22_s29, [#allocation3]  }
   0x9   :  { %s53_s9 = sshll.u32 %s1612_s3, 4  ;;  %s1544_s10 = smov [#allocation7]   ;;  %s54_s9 = int_to_ptr.hbm [resolvable:$true] %s53_s9 }
   0xa   :  { %s45_s11 = sshll.u32 %s1544_s10, 4  ;;  %s1545_s0 = smov [#allocation8]   ;;  %s46_s11 = int_to_ptr.vmem [resolvable:$true] %s45_s11 }
   0xb   :  { %48 = dma.hbm_to_vmem [thread:$0]  %s44_s7, 64, %s46_s11, [#allocation6]  }
   0xc   :  { %s55_s12 = sshll.u32 %s1545_s0, 4  ;;  %s1546_s13 = smov 64   ;;  %s56_s12 = int_to_ptr.vmem [resolvable:$true] %s55_s12 }
   0xd   :  { %s1547_s14 = smov 4  }
   0xe   :  { %61 = dma.hbm_to_vmem [thread:$0]  %s54_s9, 4096, %s56_s12, [#allocation9], %s1546_s13, %s1546_s13, %s1547_s14  }
   0xf   :  { %1532 = dma.done.wait [#allocation3], 256  }
  0x10   :  { %1533 = vsyncadd [#allocation3], 4294967040 }
  0x11   :  { %1534 = dma.done.wait [#allocation6], 8256  }
  0x12   :  { %1535 = vsyncadd [#allocation6], 4294959040 }
  0x13   :  { %1536 = dma.done.wait [#allocation9], 4096  }
  0x14   :  { %1537 = vsyncadd [#allocation9], 4294963200  ;;  %v1036_v0 = vld [vmem:[#allocation5 + $0xe0] sm:$0xf]  ;;  %v1336_v1 = vld [vmem:[#allocation5 + $0xec] sm:$0xf0] }
  0x15   :  { %v1164_v2 = vld [vmem:[#allocation5 + $0x1e0] sm:$0xf]  ;;  %v1037_v3 = vor.u32 %v1336_v1, %v1036_v0  ;;  %v1368_v4 = vld [vmem:[#allocation5 + $0x1ec] sm:$0xf0]  ;;  %v1334_v5 = vld [vmem:[#allocation5 + $0xe4] sm:$0xf] }
  0x16   :  { %v1038_v6 = vld [vmem:[#allocation5 + $0xf0] sm:$0xf0]  ;;  %v1165_v7 = vor.u32 %v1368_v4, %v1164_v2  ;;  %v1366_v9 = vld [vmem:[#allocation5 + $0x1e4] sm:$0xf]  ;;  %v1020_v11 = vld [vmem:[#allocation5 + $0xc0] sm:$0xf] }
  0x17   :  { %v1041_v8 = vor.u32 %v1334_v5, %v1038_v6  ;;  %v1166_v10 = vld [vmem:[#allocation5 + $0x1f0] sm:$0xf0]  ;;  %478 = vmatpush.bf16.msra.mxu0 %v1037_v3  ;;  %v1332_v13 = vld [vmem:[#allocation5 + $0xcc] sm:$0xf0]  ;;  %v1148_v14 = vld [vmem:[#allocation5 + $0x1c0] sm:$0xf] }
  0x18   :  { %v1169_v12 = vor.u32 %v1366_v9, %v1166_v10  ;;  %v1364_v15 = vld [vmem:[#allocation5 + $0x1cc] sm:$0xf0]  ;;  %491 = vmatpush.bf16.msra.mxu1 %v1165_v7  ;;  %v1021_v16 = vor.u32 %v1332_v13, %v1020_v11  ;;  %v1330_v18 = vld [vmem:[#allocation5 + $0xc4] sm:$0xf]  ;;  %v1022_v19 = vld [vmem:[#allocation5 + $0xd0] sm:$0xf0] }
  0x19   :  { %504 = vmatpush.bf16.msra.mxu2 %v1041_v8  ;;  %v1149_v17 = vor.u32 %v1364_v15, %v1148_v14  ;;  %v1362_v20 = vld [vmem:[#allocation5 + $0x1c4] sm:$0xf]  ;;  %v1025_v21 = vor.u32 %v1330_v18, %v1022_v19  ;;  %v1150_v22 = vld [vmem:[#allocation5 + $0x1d0] sm:$0xf0]  ;;  %v1004_v23 = vld [vmem:[#allocation5 + $0xa0] sm:$0xf] }
  0x1a   :  { %517 = vmatpush.bf16.msra.mxu3 %v1169_v12  ;;  %v1328_v24 = vld [vmem:[#allocation5 + $0xac] sm:$0xf0]  ;;  %v1153_v25 = vor.u32 %v1362_v20, %v1150_v22  ;;  %v1132_v26 = vld [vmem:[#allocation5 + $0x1a0] sm:$0xf]  ;;  %v1326_v28 = vld [vmem:[#allocation5 + $0xa4] sm:$0xf] }
  0x1b   :  { %v1360_v27 = vld [vmem:[#allocation5 + $0x1ac] sm:$0xf0]  ;;  %479 = vmatpush.bf16.msra.mxu0 %v1021_v16  ;;  %v1005_v29 = vor.u32 %v1328_v24, %v1004_v23  ;;  %v1006_v30 = vld [vmem:[#allocation5 + $0xb0] sm:$0xf0]  ;;  %v1358_v31 = vld [vmem:[#allocation5 + $0x1a4] sm:$0xf] }
  0x1c   :  { %v1134_v32 = vld [vmem:[#allocation5 + $0x1b0] sm:$0xf0]  ;;  %492 = vmatpush.bf16.msra.mxu1 %v1149_v17  ;;  %v1133_v33 = vor.u32 %v1360_v27, %v1132_v26  ;;  %v1009_v34 = vor.u32 %v1326_v28, %v1006_v30  ;;  %v988_v35 = vld [vmem:[#allocation5 + $0x80] sm:$0xf]  ;;  %v1324_v36 = vld [vmem:[#allocation5 + $0x8c] sm:$0xf0] }
  0x1d   :  { %505 = vmatpush.bf16.msra.mxu2 %v1025_v21  ;;  %v1116_v37 = vld [vmem:[#allocation5 + $0x180] sm:$0xf]  ;;  %v1137_v38 = vor.u32 %v1358_v31, %v1134_v32  ;;  %v1356_v39 = vld [vmem:[#allocation5 + $0x18c] sm:$0xf0]  ;;  %v1322_v40 = vld [vmem:[#allocation5 + $0x84] sm:$0xf]  ;;  %v989_v44 = vor.u32 %v1324_v36, %v988_v35 }
  0x1e   :  { %518 = vmatpush.bf16.msra.mxu3 %v1153_v25  ;;  %v990_v41 = vld [vmem:[#allocation5 + $0x90] sm:$0xf0]  ;;  %v1354_v42 = vld [vmem:[#allocation5 + $0x184] sm:$0xf]  ;;  %v1117_v45 = vor.u32 %v1356_v39, %v1116_v37  ;;  %v972_v47 = vld [vmem:[#allocation5 + $0x60] sm:$0xf] }
  0x1f   :  { %v1118_v43 = vld [vmem:[#allocation5 + $0x190] sm:$0xf0]  ;;  %480 = vmatpush.bf16.msra.mxu0 %v1005_v29  ;;  %v993_v46 = vor.u32 %v1322_v40, %v990_v41  ;;  %v1320_v48 = vld [vmem:[#allocation5 + $0x6c] sm:$0xf0]  ;;  %v1100_v49 = vld [vmem:[#allocation5 + $0x160] sm:$0xf] }
  0x20   :  { %493 = vmatpush.bf16.msra.mxu1 %v1133_v33  ;;  %v1121_v50 = vor.u32 %v1354_v42, %v1118_v43  ;;  %v1352_v51 = vld [vmem:[#allocation5 + $0x16c] sm:$0xf0]  ;;  %v1318_v52 = vld [vmem:[#allocation5 + $0x64] sm:$0xf]  ;;  %v974_v53 = vld [vmem:[#allocation5 + $0x70] sm:$0xf0]  ;;  %v973_v56 = vor.u32 %v1320_v48, %v972_v47 }
  0x21   :  { %506 = vmatpush.bf16.msra.mxu2 %v1009_v34  ;;  %v1350_v54 = vld [vmem:[#allocation5 + $0x164] sm:$0xf]  ;;  %v1102_v55 = vld [vmem:[#allocation5 + $0x170] sm:$0xf0]  ;;  %v1101_v57 = vor.u32 %v1352_v51, %v1100_v49  ;;  %v977_v58 = vor.u32 %v1318_v52, %v974_v53  ;;  %v956_v59 = vld [vmem:[#allocation5 + $0x40] sm:$0xf] }
  0x22   :  { %519 = vmatpush.bf16.msra.mxu3 %v1137_v38  ;;  %v1316_v60 = vld [vmem:[#allocation5 + $0x4c] sm:$0xf0]  ;;  %v1084_v61 = vld [vmem:[#allocation5 + $0x140] sm:$0xf]  ;;  %v1105_v62 = vor.u32 %v1350_v54, %v1102_v55  ;;  %v1314_v0 = vld [vmem:[#allocation5 + $0x44] sm:$0xf] }
  0x23   :  { %481 = vmatpush.bf16.msra.mxu0 %v989_v44  ;;  %v1348_v63 = vld [vmem:[#allocation5 + $0x14c] sm:$0xf0]  ;;  %v958_v1 = vld [vmem:[#allocation5 + $0x50] sm:$0xf0]  ;;  %v1346_v2 = vld [vmem:[#allocation5 + $0x144] sm:$0xf]  ;;  %v957_v4 = vor.u32 %v1316_v60, %v956_v59 }
  0x24   :  { %494 = vmatpush.bf16.msra.mxu1 %v1117_v45  ;;  %v1086_v3 = vld [vmem:[#allocation5 + $0x150] sm:$0xf0]  ;;  %v1085_v5 = vor.u32 %v1348_v63, %v1084_v61  ;;  %v961_v6 = vor.u32 %v1314_v0, %v958_v1  ;;  %v940_v7 = vld [vmem:[#allocation5 + $0x20] sm:$0xf]  ;;  %v1312_v8 = vld [vmem:[#allocation5 + $0x2c] sm:$0xf0] }
  0x25   :  { %507 = vmatpush.bf16.msra.mxu2 %v993_v46  ;;  %v1068_v9 = vld [vmem:[#allocation5 + $0x120] sm:$0xf]  ;;  %v1089_v10 = vor.u32 %v1346_v2, %v1086_v3  ;;  %v1344_v11 = vld [vmem:[#allocation5 + $0x12c] sm:$0xf0]  ;;  %v1310_v12 = vld [vmem:[#allocation5 + $0x24] sm:$0xf]  ;;  %v941_v16 = vor.u32 %v1312_v8, %v940_v7 }
  0x26   :  { %520 = vmatpush.bf16.msra.mxu3 %v1121_v50  ;;  %v942_v13 = vld [vmem:[#allocation5 + $0x30] sm:$0xf0]  ;;  %v1342_v14 = vld [vmem:[#allocation5 + $0x124] sm:$0xf]  ;;  %v924_v17 = vld [vmem:[#allocation5] sm:$0xf]  ;;  %v1069_v19 = vor.u32 %v1344_v11, %v1068_v9 }
  0x27   :  { %482 = vmatpush.bf16.msra.mxu0 %v973_v56  ;;  %v1070_v15 = vld [vmem:[#allocation5 + $0x130] sm:$0xf0]  ;;  %v1308_v18 = vld [vmem:[#allocation5 + $0xc] sm:$0xf0]  ;;  %v945_v20 = vor.u32 %v1310_v12, %v942_v13  ;;  %v1052_v21 = vld [vmem:[#allocation5 + $0x100] sm:$0xf] }
  0x28   :  { %495 = vmatpush.bf16.msra.mxu1 %v1101_v57  ;;  %v1340_v22 = vld [vmem:[#allocation5 + $0x10c] sm:$0xf0]  ;;  %v1306_v23 = vld [vmem:[#allocation5 + $0x4] sm:$0xf]  ;;  %v1073_v24 = vor.u32 %v1342_v14, %v1070_v15  ;;  %v926_v25 = vld [vmem:[#allocation5 + $0x10] sm:$0xf0]  ;;  %v925_v31 = vor.u32 %v1308_v18, %v924_v17 }
  0x29   :  { %508 = vmatpush.bf16.msra.mxu2 %v977_v58  ;;  %v1338_v26 = vld [vmem:[#allocation5 + $0x104] sm:$0xf]  ;;  %v1054_v27 = vld [vmem:[#allocation5 + $0x110] sm:$0xf0]  ;;  %v1044_v28 = vld [vmem:[#allocation5 + $0xe8] sm:$0xf]  ;;  %v1053_v35 = vor.u32 %v1340_v22, %v1052_v21  ;;  %v929_v36 = vor.u32 %v1306_v23, %v926_v25 }
  0x2a   :  { %521 = vmatpush.bf16.msra.mxu3 %v1105_v62  ;;  %v1337_v29 = vld [vmem:[#allocation5 + $0xf4] sm:$0xf0]  ;;  %v1172_v30 = vld [vmem:[#allocation5 + $0x1e8] sm:$0xf]  ;;  %v1335_v33 = vld [vmem:[#allocation5 + $0xec] sm:$0xf]  ;;  %v1057_v40 = vor.u32 %v1338_v26, %v1054_v27 }
  0x2b   :  { %483 = vmatpush.bf16.msra.mxu0 %v957_v4  ;;  %v1369_v32 = vld [vmem:[#allocation5 + $0x1f4] sm:$0xf0]  ;;  %v1046_v34 = vld [vmem:[#allocation5 + $0xf8] sm:$0xf0]  ;;  %v1367_v37 = vld [vmem:[#allocation5 + $0x1ec] sm:$0xf]  ;;  %v1045_v41 = vor.u32 %v1337_v29, %v1044_v28 }
  0x2c   :  { %496 = vmatpush.bf16.msra.mxu1 %v1085_v5  ;;  %v1174_v38 = vld [vmem:[#allocation5 + $0x1f8] sm:$0xf0]  ;;  %v80_v39 = vld [vmem:[#allocation2] sm:$0xff]  ;;  %v1173_v43 = vor.u32 %v1369_v32, %v1172_v30  ;;  %v1049_v44 = vor.u32 %v1335_v33, %v1046_v34  ;;  %v1028_v45 = vld [vmem:[#allocation5 + $0xc8] sm:$0xf]  ;;  %s1548_s15 = smov [#allocation10]  }
  0x2d   :  { %509 = vmatpush.bf16.msra.mxu2 %v961_v6  ;;  %v81_v42 = vld [vmem:[#allocation2 + $0x8] sm:$0xff]  ;;  %v1156_v47 = vld [vmem:[#allocation5 + $0x1c8] sm:$0xf]  ;;  %v1177_v48 = vor.u32 %v1367_v37, %v1174_v38  ;;  %v1331_v50 = vld [vmem:[#allocation5 + $0xcc] sm:$0xf]  ;;  %v1591_v52 = vpack.c.bf16 %v80_v39, %v80_v39  ;;  %s908_s16 = sshll.u32 %s1548_s15, 4  ;;  %s909_s16 = int_to_ptr.vmem [resolvable:$true] %s908_s16 }
  0x2e   :  { %522 = vmatpush.bf16.msra.mxu3 %v1089_v10  ;;  %v1333_v46 = vld [vmem:[#allocation5 + $0xd4] sm:$0xf0]  ;;  %v1030_v51 = vld [vmem:[#allocation5 + $0xd8] sm:$0xf0]  ;;  %v1363_v53 = vld [vmem:[#allocation5 + $0x1cc] sm:$0xf]  ;;  %v1593_v55 = vpack.c.bf16 %v81_v42, %v81_v42 }
  0x2f   :  { %484 = vmatpush.bf16.msra.mxu0 %v941_v16  ;;  %v1365_v49 = vld [vmem:[#allocation5 + $0x1d4] sm:$0xf0]  ;;  %v1158_v54 = vld [vmem:[#allocation5 + $0x1d8] sm:$0xf0]  ;;  %v1029_v56 = vor.u32 %v1333_v46, %v1028_v45  ;;  %v1033_v58 = vor.u32 %v1331_v50, %v1030_v51  ;;  %v1012_v59 = vld [vmem:[#allocation5 + $0xa8] sm:$0xf] }
  0x30   :  { %497 = vmatpush.bf16.msra.mxu1 %v1069_v19  ;;  %v1157_v57 = vor.u32 %v1365_v49, %v1156_v47  ;;  %v1329_v60 = vld [vmem:[#allocation5 + $0xb4] sm:$0xf0]  ;;  %v1140_v61 = vld [vmem:[#allocation5 + $0x1a8] sm:$0xf]  ;;  %v1161_v62 = vor.u32 %v1363_v53, %v1158_v54  ;;  %v1327_v0 = vld [vmem:[#allocation5 + $0xac] sm:$0xf] }
  0x31   :  { %510 = vmatpush.bf16.msra.mxu2 %v945_v20  ;;  %v1361_v63 = vld [vmem:[#allocation5 + $0x1b4] sm:$0xf0]  ;;  %v1014_v1 = vld [vmem:[#allocation5 + $0xb8] sm:$0xf0]  ;;  %v1359_v2 = vld [vmem:[#allocation5 + $0x1ac] sm:$0xf]  ;;  %v1013_v4 = vor.u32 %v1329_v60, %v1012_v59 }
  0x32   :  { %523 = vmatpush.bf16.msra.mxu3 %v1073_v24  ;;  %v1142_v3 = vld [vmem:[#allocation5 + $0x1b8] sm:$0xf0]  ;;  %v1141_v5 = vor.u32 %v1361_v63, %v1140_v61  ;;  %v1017_v6 = vor.u32 %v1327_v0, %v1014_v1  ;;  %v996_v7 = vld [vmem:[#allocation5 + $0x88] sm:$0xf]  ;;  %v1325_v8 = vld [vmem:[#allocation5 + $0x94] sm:$0xf0] }
  0x33   :  { %485 = vmatpush.bf16.msra.mxu0 %v925_v31  ;;  %v1124_v9 = vld [vmem:[#allocation5 + $0x188] sm:$0xf]  ;;  %v1145_v10 = vor.u32 %v1359_v2, %v1142_v3  ;;  %v1357_v11 = vld [vmem:[#allocation5 + $0x194] sm:$0xf0]  ;;  %v1323_v12 = vld [vmem:[#allocation5 + $0x8c] sm:$0xf]  ;;  %v997_v16 = vor.u32 %v1325_v8, %v996_v7 }
  0x34   :  { %498 = vmatpush.bf16.msra.mxu1 %v1053_v35  ;;  %v998_v13 = vld [vmem:[#allocation5 + $0x98] sm:$0xf0]  ;;  %v1355_v14 = vld [vmem:[#allocation5 + $0x18c] sm:$0xf]  ;;  %v1125_v17 = vor.u32 %v1357_v11, %v1124_v9  ;;  %v980_v19 = vld [vmem:[#allocation5 + $0x68] sm:$0xf] }
  0x35   :  { %511 = vmatpush.bf16.msra.mxu2 %v929_v36  ;;  %v1126_v15 = vld [vmem:[#allocation5 + $0x198] sm:$0xf0]  ;;  %v1001_v18 = vor.u32 %v1323_v12, %v998_v13  ;;  %v1321_v20 = vld [vmem:[#allocation5 + $0x74] sm:$0xf0]  ;;  %v1108_v21 = vld [vmem:[#allocation5 + $0x168] sm:$0xf] }
  0x36   :  { %524 = vmatpush.bf16.msra.mxu3 %v1057_v40  ;;  %486 = vmatmul.bf16.vlgmr.msra.gmra.mxu0 %v1591_v52  ;;  %v1129_v22 = vor.u32 %v1355_v14, %v1126_v15  ;;  %v1353_v23 = vld [vmem:[#allocation5 + $0x174] sm:$0xf0]  ;;  %v1319_v24 = vld [vmem:[#allocation5 + $0x6c] sm:$0xf]  ;;  %v982_v25 = vld [vmem:[#allocation5 + $0x78] sm:$0xf0]  ;;  %v981_v28 = vor.u32 %v1321_v20, %v980_v19 }
  0x37   :  { %530 = vmatpush.bf16.msrb.mxu0 %v1045_v41  ;;  %499 = vmatmul.bf16.vlgmr.msra.gmra.mxu1 %v1593_v55  ;;  %v1351_v26 = vld [vmem:[#allocation5 + $0x16c] sm:$0xf]  ;;  %v1110_v27 = vld [vmem:[#allocation5 + $0x178] sm:$0xf0]  ;;  %v964_v29 = vld [vmem:[#allocation5 + $0x48] sm:$0xf]  ;;  %v1109_v30 = vor.u32 %v1353_v23, %v1108_v21  ;;  %v985_v31 = vor.u32 %v1319_v24, %v982_v25 }
  0x38   :  { %543 = vmatpush.bf16.msrb.mxu1 %v1173_v43  ;;  %512 = vmatmul.bf16.vlgmr.msra.gmra.mxu2 %v1591_v52  ;;  %v1317_v32 = vld [vmem:[#allocation5 + $0x54] sm:$0xf0]  ;;  %v1092_v33 = vld [vmem:[#allocation5 + $0x148] sm:$0xf]  ;;  %v1113_v34 = vor.u32 %v1351_v26, %v1110_v27  ;;  %v1315_v36 = vld [vmem:[#allocation5 + $0x4c] sm:$0xf] }
  0x39   :  { %556 = vmatpush.bf16.msrb.mxu2 %v1049_v44  ;;  %525 = vmatmul.bf16.vlgmr.msra.gmra.mxu3 %v1593_v55  ;;  %v1349_v35 = vld [vmem:[#allocation5 + $0x154] sm:$0xf0]  ;;  %v966_v37 = vld [vmem:[#allocation5 + $0x58] sm:$0xf0]  ;;  %v1347_v38 = vld [vmem:[#allocation5 + $0x14c] sm:$0xf]  ;;  %v965_v40 = vor.u32 %v1317_v32, %v964_v29 }
  0x3a   :  { %569 = vmatpush.bf16.msrb.mxu3 %v1177_v48  ;;  %v1094_v39 = vld [vmem:[#allocation5 + $0x158] sm:$0xf0]  ;;  %v1093_v41 = vor.u32 %v1349_v35, %v1092_v33  ;;  %v969_v42 = vor.u32 %v1315_v36, %v966_v37  ;;  %v948_v43 = vld [vmem:[#allocation5 + $0x28] sm:$0xf]  ;;  %v1313_v44 = vld [vmem:[#allocation5 + $0x34] sm:$0xf0] }
  0x3b   :  { %531 = vmatpush.bf16.msrb.mxu0 %v1029_v56  ;;  %v1076_v45 = vld [vmem:[#allocation5 + $0x128] sm:$0xf]  ;;  %v1097_v46 = vor.u32 %v1347_v38, %v1094_v39  ;;  %v1345_v47 = vld [vmem:[#allocation5 + $0x134] sm:$0xf0]  ;;  %v1311_v48 = vld [vmem:[#allocation5 + $0x2c] sm:$0xf]  ;;  %v949_v53 = vor.u32 %v1313_v44, %v948_v43 }
  0x3c   :  { %544 = vmatpush.bf16.msrb.mxu1 %v1157_v57  ;;  %v950_v49 = vld [vmem:[#allocation5 + $0x38] sm:$0xf0]  ;;  %v1343_v50 = vld [vmem:[#allocation5 + $0x12c] sm:$0xf]  ;;  %v1077_v54 = vor.u32 %v1345_v47, %v1076_v45  ;;  %v932_v57 = vld [vmem:[#allocation5 + $0x8] sm:$0xf] }
  0x3d   :  { %557 = vmatpush.bf16.msrb.mxu2 %v1033_v58  ;;  %v1078_v51 = vld [vmem:[#allocation5 + $0x138] sm:$0xf0]  ;;  %v953_v56 = vor.u32 %v1311_v48, %v950_v49  ;;  %v1309_v58 = vld [vmem:[#allocation5 + $0x14] sm:$0xf0]  ;;  %v1060_v59 = vld [vmem:[#allocation5 + $0x108] sm:$0xf] }
  0x3e   :  { %570 = vmatpush.bf16.msrb.mxu3 %v1161_v62  ;;  %v1081_v60 = vor.u32 %v1343_v50, %v1078_v51  ;;  %v1341_v61 = vld [vmem:[#allocation5 + $0x114] sm:$0xf0]  ;;  %v1307_v62 = vld [vmem:[#allocation5 + $0xc] sm:$0xf]  ;;  %v934_v63 = vld [vmem:[#allocation5 + $0x18] sm:$0xf0]  ;;  %v933_v2 = vor.u32 %v1309_v58, %v932_v57 }
  0x3f   :  { %532 = vmatpush.bf16.msrb.mxu0 %v1013_v4  ;;  %v1339_v0 = vld [vmem:[#allocation5 + $0x10c] sm:$0xf]  ;;  %v1062_v1 = vld [vmem:[#allocation5 + $0x118] sm:$0xf0]  ;;  %v1061_v3 = vor.u32 %v1341_v61, %v1060_v59  ;;  %v937_v4 = vor.u32 %v1307_v62, %v934_v63  ;;  %v1376_v9 = vld [vmem:[#allocation8 + $0x30] sm:$0xff]  ;;  %s910_s19 = sshll.u32 %s1614_s5, 4  ;;  %s911_s19 = int_to_ptr.hbm [resolvable:$true] %s910_s19 }
  0x40   :  { %545 = vmatpush.bf16.msrb.mxu1 %v1141_v5  ;;  %v1065_v5 = vor.u32 %v1339_v0, %v1062_v1  ;;  %v1385_v7 = vld [vmem:[#allocation8 + $0x78] sm:$0xff]  ;;  %v1375_v11 = vld [vmem:[#allocation8 + $0x28] sm:$0xff]  ;;  %v1374_v13 = vld [vmem:[#allocation8 + $0x20] sm:$0xff] }
  0x41   :  { %558 = vmatpush.bf16.msrb.mxu2 %v1017_v6  ;;  %v1377_v6 = vld [vmem:[#allocation8 + $0x38] sm:$0xff]  ;;  %v1383_v12 = vld [vmem:[#allocation8 + $0x68] sm:$0xff]  ;;  %v1382_v14 = vld [vmem:[#allocation8 + $0x60] sm:$0xff] }
  0x42   :  { %571 = vmatpush.bf16.msrb.mxu3 %v1145_v10  ;;  %v1393_v8 = vld [vmem:[#allocation8 + $0xb8] sm:$0xff]  ;;  %v1384_v10 = vld [vmem:[#allocation8 + $0x70] sm:$0xff]  ;;  %v1379_v19 = vld [vmem:[#allocation8 + $0x48] sm:$0xff] }
  0x43   :  { %533 = vmatpush.bf16.msrb.mxu0 %v997_v16  ;;  %v1373_v15 = vld [vmem:[#allocation8 + $0x18] sm:$0xff]  ;;  %v1391_v21 = vld [vmem:[#allocation8 + $0xa8] sm:$0xff]  ;;  %v1378_v23 = vld [vmem:[#allocation8 + $0x40] sm:$0xff] }
  0x44   :  { %546 = vmatpush.bf16.msrb.mxu1 %v1125_v17  ;;  %v1381_v16 = vld [vmem:[#allocation8 + $0x58] sm:$0xff]  ;;  %v1372_v17 = vld [vmem:[#allocation8 + $0x10] sm:$0xff]  ;;  %v1390_v25 = vld [vmem:[#allocation8 + $0xa0] sm:$0xff] }
  0x45   :  { %559 = vmatpush.bf16.msrb.mxu2 %v1001_v18  ;;  %v1380_v18 = vld [vmem:[#allocation8 + $0x50] sm:$0xff]  ;;  %v1401_v20 = vld [vmem:[#allocation8 + $0xf8] sm:$0xff]  ;;  %v1399_v26 = vld [vmem:[#allocation8 + $0xe8] sm:$0xff] }
  0x46   :  { %572 = vmatpush.bf16.msrb.mxu3 %v1129_v22  ;;  %v1370_v22 = vld [vmem:[#allocation8] sm:$0xff]  ;;  %v1400_v24 = vld [vmem:[#allocation8 + $0xf0] sm:$0xff]  ;;  %v1389_v27 = vld [vmem:[#allocation8 + $0x98] sm:$0xff] }
  0x47   :  { %534 = vmatpush.bf16.msrb.mxu0 %v981_v28  ;;  %v1398_v28 = vld [vmem:[#allocation8 + $0xe0] sm:$0xff]  ;;  %v1388_v29 = vld [vmem:[#allocation8 + $0x90] sm:$0xff]  ;;  %v1387_v33 = vld [vmem:[#allocation8 + $0x88] sm:$0xff] }
  0x48   :  { %547 = vmatpush.bf16.msrb.mxu1 %v1109_v30  ;;  %v148_v30 = vld [vmem:[#allocation7] sm:$0xf]  ;;  %v1396_v35 = vld [vmem:[#allocation8 + $0xd0] sm:$0xff]  ;;  %v1386_v39 = vld [vmem:[#allocation8 + $0x80] sm:$0xff] }
  0x49   :  { %560 = vmatpush.bf16.msrb.mxu2 %v985_v31  ;;  %v1397_v31 = vld [vmem:[#allocation8 + $0xd8] sm:$0xff]  ;;  %v150_v32 = vperm.slane %v148_v30, 0  ;;  %v151_v38 = vperm.slane %v148_v30, 1  ;;  %v1394_v49 = vld [vmem:[#allocation8 + $0xc0] sm:$0xff]  ;;  %v152_v57 = vperm.slane %v148_v30, 2  ;;  %v153_v62 = vperm.slane %v148_v30, 3 }
  0x4a   :  { %573 = vmatpush.bf16.msrb.mxu3 %v1113_v34 }
  0x4b   :  { %535 = vmatpush.bf16.msrb.mxu0 %v965_v40 }
  0x4c   :  { %548 = vmatpush.bf16.msrb.mxu1 %v1093_v41  ;;  %v1395_v41 = vld [vmem:[#allocation8 + $0xc8] sm:$0xff] }
  0x4d   :  { %561 = vmatpush.bf16.msrb.mxu2 %v969_v42 }
  0x4e   :  { %574 = vmatpush.bf16.msrb.mxu3 %v1097_v46 }
  0x4f   :  { %536 = vmatpush.bf16.msrb.mxu0 %v949_v53 }
  0x50   :  { %549 = vmatpush.bf16.msrb.mxu1 %v1077_v54 }
  0x51   :  { %562 = vmatpush.bf16.msrb.mxu2 %v953_v56 }
  0x52   :  { %575 = vmatpush.bf16.msrb.mxu3 %v1081_v60 }
  0x53   :  { %537 = vmatpush.bf16.msrb.mxu0 %v933_v2 }
  0x54   :  { %550 = vmatpush.bf16.msrb.mxu1 %v1061_v3 }
  0x55   :  { %563 = vmatpush.bf16.msrb.mxu2 %v937_v4 }
  0x56   :  { %576 = vmatpush.bf16.msrb.mxu3 %v1065_v5  ;;  %538 = vmatmul.bf16.vlgmr.msrb.gmra.mxu0 %v1591_v52 }
  0x57   :  { %850 = vmatpush.bf16.msra.mxu0 %v1377_v6  ;;  %551 = vmatmul.bf16.vlgmr.msrb.gmra.mxu1 %v1593_v55 }
  0x58   :  { %863 = vmatpush.bf16.msra.mxu1 %v1385_v7  ;;  %564 = vmatmul.bf16.vlgmr.msrb.gmra.mxu2 %v1591_v52  ;;  %v1392_v52 = vld [vmem:[#allocation8 + $0xb0] sm:$0xff] }
  0x59   :  { %577 = vmatmul.bf16.vlgmr.msrb.gmra.mxu3 %v1593_v55  ;;  %876 = vmatpush.bf16.msra.mxu2 %v1393_v8  ;;  %v1371_v55 = vld [vmem:[#allocation8 + $0x8] sm:$0xff] }
  0x5a   :  { %889 = vmatpush.bf16.msra.mxu3 %v1401_v20 }
  0x5b   :  { %851 = vmatpush.bf16.msra.mxu0 %v1376_v9 }
  0x5c   :  { %864 = vmatpush.bf16.msra.mxu1 %v1384_v10 }
  0x5d   :  { %877 = vmatpush.bf16.msra.mxu2 %v1392_v52 }
  0x5e   :  { %890 = vmatpush.bf16.msra.mxu3 %v1400_v24 }
  0x5f   :  { %852 = vmatpush.bf16.msra.mxu0 %v1375_v11 }
  0x60   :  { %865 = vmatpush.bf16.msra.mxu1 %v1383_v12 }
  0x61   :  { %878 = vmatpush.bf16.msra.mxu2 %v1391_v21 }
  0x62   :  { %891 = vmatpush.bf16.msra.mxu3 %v1399_v26 }
  0x63   :  { %853 = vmatpush.bf16.msra.mxu0 %v1374_v13 }
  0x64   :  { %866 = vmatpush.bf16.msra.mxu1 %v1382_v14 }
  0x65   :  { %879 = vmatpush.bf16.msra.mxu2 %v1390_v25 }
  0x66   :  { %892 = vmatpush.bf16.msra.mxu3 %v1398_v28 }
  0x67   :  { %854 = vmatpush.bf16.msra.mxu0 %v1373_v15  ;;  %v1411_v15 = vld [vmem:[%s1613_s4] ss:$0 sm:$0xff] }
  0x68   :  { %867 = vmatpush.bf16.msra.mxu1 %v1381_v16 }
  0x69   :  { %880 = vmatpush.bf16.msra.mxu2 %v1389_v27 }
  0x6a   :  { %893 = vmatpush.bf16.msra.mxu3 %v1397_v31 }
  0x6b   :  { %855 = vmatpush.bf16.msra.mxu0 %v1372_v17 }
  0x6c   :  { %868 = vmatpush.bf16.msra.mxu1 %v1380_v18 }
  0x6d   :  { %881 = vmatpush.bf16.msra.mxu2 %v1388_v29 }
  0x6e   :  { %894 = vmatpush.bf16.msra.mxu3 %v1396_v35 }
  0x6f   :  { %856 = vmatpush.bf16.msra.mxu0 %v1371_v55 }
  0x70   :  { %869 = vmatpush.bf16.msra.mxu1 %v1379_v19 }
  0x71   :  { %882 = vmatpush.bf16.msra.mxu2 %v1387_v33 }
  0x72   :  { %895 = vmatpush.bf16.msra.mxu3 %v1395_v41 }
  0x73   :  { %857 = vmatpush.bf16.msra.mxu0 %v1370_v22 }
  0x74   :  { %870 = vmatpush.bf16.msra.mxu1 %v1378_v23 }
  0x75   :  { %883 = vmatpush.bf16.msra.mxu2 %v1386_v39 }
  0x76   :  { %896 = vmatpush.bf16.msra.mxu3 %v1394_v49 }
  0xb3   :  { %v487_v34 = vpop.f32.mrf.mxu0 }
  0xb4   :  { %v488_v36 = vadd.f32 %v487_v34, %v150_v32  ;;  %v500_v37 = vpop.f32.mrf.mxu1 }
  0xb6   :  { %v501_v40 = vadd.f32 %v500_v37, %v488_v36 }
  0xb8   :  { %v582_v43 = vmax.f32 %v501_v40, 0.0 }
  0xba   :  { %v586_v46 = vpack.c.bf16 %v582_v43, %v582_v43 }
  0xbb   :  { %v513_v42 = vpop.f32.mrf.mxu2  ;;  %v489_v48 = vpop.f32.mrf.mxu0 }
  0xbc   :  { %v514_v44 = vadd.f32 %v513_v42, %v151_v38  ;;  %v526_v45 = vpop.f32.mrf.mxu3  ;;  %858 = vmatmul.bf16.vlgmr.msra.gmra.mxu0 %v586_v46  ;;  %v502_v50 = vpop.f32.mrf.mxu1 }
  0xbe   :  { %v527_v47 = vadd.f32 %v526_v45, %v514_v44 }
  0xc0   :  { %v583_v51 = vmax.f32 %v527_v47, 0.0 }
  0xc2   :  { %v587_v53 = vpack.c.bf16 %v583_v51, %v583_v51 }
  0xc3   :  { %v515_v54 = vpop.f32.mrf.mxu2 }
  0xc4   :  { %871 = vmatmul.bf16.vlgmr.msra.gmra.mxu1 %v587_v53  ;;  %v528_v56 = vpop.f32.mrf.mxu3 }
  0xd3   :  { %v539_v58 = vpop.f32.mrf.mxu0 }
  0xd4   :  { %v540_v59 = vadd.f32 %v539_v58, %v152_v57  ;;  %v552_v60 = vpop.f32.mrf.mxu1 }
  0xd6   :  { %v553_v61 = vadd.f32 %v552_v60, %v540_v59 }
  0xd8   :  { %v584_v63 = vmax.f32 %v553_v61, 0.0 }
  0xda   :  { %v588_v0 = vpack.c.bf16 %v584_v63, %v584_v63 }
  0xdb   :  { %v565_v1 = vpop.f32.mrf.mxu2  ;;  %v541_v4 = vpop.f32.mrf.mxu0 }
  0xdc   :  { %v566_v2 = vadd.f32 %v565_v1, %v153_v62  ;;  %v578_v3 = vpop.f32.mrf.mxu3  ;;  %v554_v5 = vpop.f32.mrf.mxu1  ;;  %884 = vmatmul.bf16.vlgmr.msra.gmra.mxu2 %v588_v0 }
  0xde   :  { %v579_v6 = vadd.f32 %v578_v3, %v566_v2 }
  0xe0   :  { %v585_v7 = vmax.f32 %v579_v6, 0.0 }
  0xe2   :  { %v589_v8 = vpack.c.bf16 %v585_v7, %v585_v7 }
  0xe3   :  { %v567_v9 = vpop.f32.mrf.mxu2 }
  0xe4   :  { %v580_v10 = vpop.f32.mrf.mxu3  ;;  %897 = vmatmul.bf16.vlgmr.msra.gmra.mxu3 %v589_v8 }
 0x139   :  { %v859_v11 = vpop.f32.mrf.mxu0 }
 0x13a   :  { %v860_v16 = vadd.f32 %v1411_v15, %v859_v11 }
 0x141   :  { %v872_v12 = vpop.f32.mrf.mxu1  ;;  %v861_v13 = vpop.f32.mrf.mxu0 }
 0x142   :  { %v873_v18 = vadd.f32 %v872_v12, %v860_v16 }
 0x149   :  { %v874_v14 = vpop.f32.mrf.mxu1 }
 0x15f   :  { %v885_v17 = vpop.f32.mrf.mxu2 }
 0x160   :  { %v886_v52 = vadd.f32 %v885_v17, %v873_v18 }
 0x167   :  { %v898_v55 = vpop.f32.mrf.mxu3  ;;  %v887_v20 = vpop.f32.mrf.mxu2 }
 0x168   :  { %v899_v19 = vadd.f32 %v898_v55, %v886_v52 }
 0x16a   :  { %902 = vst [vmem:[#allocation10] sm:$0xff] %v899_v19 }
 0x16b   :  { %913 = dma.vmem_to_hbm [thread:$0]  %s909_s16, 128, %s911_s19, [#allocation4]  }
 0x16f   :  { %v900_v21 = vpop.f32.mrf.mxu3 }
 0x170   :  { %1538 = dma.done.wait [#allocation4], 128  }
 0x171   :  { %1539 = vsyncadd [#allocation4], 4294967168 }
 0x172   :  { %918 = vsyncpa [#allocation3], 1 }
 0x173   :  { %919 = vsyncpa [#allocation6], 1 }
 0x174   :  { %920 = vsyncpa [#allocation9], 1 }
 0x175   :  { %921 = vsyncpa [#allocation4], 1 }

</bundles_post_ra>
